<compile_context>
chip_gen: v7x
topology: tpu7x:2x2x1
jax: 0.10.0
libtpu: 0.0.40
codegen_flags: <defaults>
</compile_context>

<pallas_src>
import math
import jax
import jax.numpy as jnp
from jax.experimental import pallas as pl
from jax.experimental.pallas import tpu as pltpu

ZDIM = 8
INPUT_SIZE = 32
H1 = 64          # arch[0][0]  (== arch[1][0])
H2 = 64          # arch[1][1]  (== arch[4][0])
OUT = 2 * ZDIM   # body5 output width
LN_EPS = 1e-5

_INV_SQRT2 = 1.0 / math.sqrt(2.0)


def _round_up(n, m):
    return ((n + m - 1) // m) * m


def _gelu_exact(x):
    # exact (erf) GELU, matches torch.nn.GELU default
    return 0.5 * x * (1.0 + jax.lax.erf(x * _INV_SQRT2))


def _layernorm_feat0(h, gamma, beta, eps=LN_EPS):
    """LayerNorm over the feature axis (axis 0) of an (H, TB) tile.

    Two-pass mean/var (like PyTorch) -> no catastrophic cancellation.
    gamma/beta are (H, 1) columns; mean/var are (1, TB) rows.
    """
    n = h.shape[0]
    mean = jnp.sum(h, axis=0, keepdims=True) * (1.0 / n)
    xm = h - mean
    var = jnp.sum(xm * xm, axis=0, keepdims=True) * (1.0 / n)
    return xm * jax.lax.rsqrt(var + eps) * gamma + beta


def encoder_kernel(xT_ref,
                   w1_ref, b1_ref, g1_ref, be1_ref,
                   w2_ref, b2_ref, g2_ref, be2_ref,
                   w5_ref, b5_ref,
                   out_ref):
    # xT_ref: (INPUT_SIZE, TB) -- batch on the lane axis everywhere below.
    x = xT_ref[...]

    # ---- body1: Linear(input_size -> H1) + LayerNorm(H1) + GELU ----
    h = jnp.dot(w1_ref[...], x, preferred_element_type=jnp.float32) + b1_ref[...]
    h = _layernorm_feat0(h, g1_ref[...], be1_ref[...])
    h = _gelu_exact(h)

    # ---- body2: Linear(H1 -> H2) + LayerNorm(H2) + GELU ----
    h = jnp.dot(w2_ref[...], h, preferred_element_type=jnp.float32) + b2_ref[...]
    h = _layernorm_feat0(h, g2_ref[...], be2_ref[...])
    h = _gelu_exact(h)

    # ---- body5: Linear(H2 -> 2*zdim); exp only on the sigma rows ----
    s = jnp.dot(w5_ref[...], h, preferred_element_type=jnp.float32) + b5_ref[...]
    out_ref[:ZDIM, :] = s[:ZDIM, :]            # mu rows (sublane-aligned slice)
    out_ref[ZDIM:, :] = jnp.exp(s[ZDIM:, :])   # std rows


def _choose_tb(B, tb_max):
    """Batch tile (lane axis). Multiple of 128 (or == B when B <= 128),
    capped at 4096 (VMEM-safe on every generation incl. v7x), and sized so
    the grid has >= 2 (preferably 4) steps for v7x megacore sharding."""
    if B <= 128:
        return B                                   # full-array block
    tb_max = max(128, (min(tb_max, 4096) // 128) * 128)
    target_steps = 4 if B >= 4 * 128 else 2
    tb = _round_up(pl.cdiv(B, target_steps), 128)
    return max(128, min(tb, tb_max))


def encoder_forward(x, params, tb=2048):
    """x: (B, INPUT_SIZE) f32. Returns (mu, std), each (B, ZDIM)."""
    B = x.shape[0]
    (w1, b1, g1, be1, w2, b2, g2, be2, w5, b5) = params

    # Feature-major: batch on the lane axis (lane-dense vregs / DMAs / stores).
    xT = x.T                                        # (INPUT_SIZE, B)

    TB = _choose_tb(B, tb)
    grid = (pl.cdiv(B, TB),)   # ragged batch -> partial last block, no jnp.pad copy

    const = lambda a: pl.BlockSpec(a.shape, lambda i: (0,) * a.ndim)

    # Advisory cost for XLA scheduling around the custom call.
    flops = 2 * B * (INPUT_SIZE * H1 + H1 * H2 + H2 * OUT)
    transcendentals = B * (H1 + H2 + ZDIM)          # erf + erf + exp
    bytes_accessed = 4 * (B * (INPUT_SIZE + OUT)
                          + INPUT_SIZE * H1 + 3 * H1
                          + H1 * H2 + 3 * H2
                          + H2 * OUT + OUT)
    cost = pl.CostEstimate(flops=flops,
                           transcendentals=transcendentals,
                           bytes_accessed=bytes_accessed)

    out = pl.pallas_call(
        encoder_kernel,
        out_shape=jax.ShapeDtypeStruct((OUT, B), jnp.float32),
        grid_spec=pltpu.PrefetchScalarGridSpec(
            num_scalar_prefetch=0,
            grid=grid,
            in_specs=[
                pl.BlockSpec((INPUT_SIZE, TB), lambda i: (0, i)),
                const(w1), const(b1), const(g1), const(be1),
                const(w2), const(b2), const(g2), const(be2),
                const(w5), const(b5),
            ],
            out_specs=pl.BlockSpec((OUT, TB), lambda i: (0, i)),
        ),
        compiler_params=pltpu.CompilerParams(
            dimension_semantics=("parallel",)),   # batch shards across v7x's 2 TCs
        cost_estimate=cost,
    )(xT, w1, b1, g1, be1, w2, b2, g2, be2, w5, b5)

    # Cheap wrapper-side split + transpose back to (B, ZDIM).
    mu = out[:ZDIM, :B].T
    std = out[ZDIM:, :B].T
    return mu, std


def init_params(key):
    """PyTorch-style init. Weights kept in native (out, in) form; biases and
    LayerNorm params stored as (out, 1) columns (feature axis = sublanes)."""
    ks = jax.random.split(key, 6)

    def linear(kw, kb, fan_in, fan_out):
        bound = 1.0 / math.sqrt(fan_in)
        w = jax.random.uniform(kw, (fan_out, fan_in), jnp.float32, -bound, bound)
        b = jax.random.uniform(kb, (fan_out, 1), jnp.float32, -bound, bound)
        return w, b

    w1, b1 = linear(ks[0], ks[1], INPUT_SIZE, H1)
    w2, b2 = linear(ks[2], ks[3], H1, H2)
    w5, b5 = linear(ks[4], ks[5], H2, OUT)
    # LayerNorm affine params (PyTorch default: ones / zeros)
    g1 = jnp.ones((H1, 1), jnp.float32)
    be1 = jnp.zeros((H1, 1), jnp.float32)
    g2 = jnp.ones((H2, 1), jnp.float32)
    be2 = jnp.zeros((H2, 1), jnp.float32)
    return (w1, b1, g1, be1, w2, b2, g2, be2, w5, b5)


def encoder_ref(x, params):
    """Pure-JAX reference mirroring the PyTorch forward."""
    (w1, b1, g1, be1, w2, b2, g2, be2, w5, b5) = params

    def ln(h, g, be):
        mean = jnp.mean(h, axis=-1, keepdims=True)
        var = jnp.mean(jnp.square(h - mean), axis=-1, keepdims=True)
        return (h - mean) / jnp.sqrt(var + LN_EPS) * g.T + be.T

    h = x @ w1.T + b1.T
    h = _gelu_exact(ln(h, g1, be1))
    h = h @ w2.T + b2.T
    h = _gelu_exact(ln(h, g2, be2))
    scores = h @ w5.T + b5.T
    return scores[:, :ZDIM], jnp.exp(scores[:, ZDIM:])


if __name__ == "__main__":
    key = jax.random.PRNGKey(0)
    kx, kp = jax.random.split(key)
    params = init_params(kp)

    # (B, seed): small batch, ragged batch, and a multi-block ragged batch
    # (exercises the cdiv grid + partial last block path).
    for B, seed in ((8, 0), (13, 1), (300, 2)):
        x = jax.random.normal(jax.random.PRNGKey(seed), (B, INPUT_SIZE), jnp.float32)
        mu, std = encoder_forward(x, params)
        jax.block_until_ready((mu, std))
        mu_r, std_r = encoder_ref(x, params)
        assert mu.shape == (B, ZDIM) and std.shape == (B, ZDIM)
        assert jnp.allclose(mu, mu_r, atol=2e-5, rtol=2e-5), f"mu mismatch at B={B}"
        assert jnp.allclose(std, std_r, atol=2e-5, rtol=2e-5), f"std mismatch at B={B}"

    print("KERNEL_OK")
</pallas_src>

<mosaic_0001>
module attributes {stable_mosaic.version = 11 : i64} {
  func.func @encoder_kernel(%arg0: i32, %arg1: memref<32x8xf32, #tpu.memory_space<vmem>>, %arg2: memref<64x32xf32, #tpu.memory_space<vmem>>, %arg3: memref<64x1xf32, #tpu.memory_space<vmem>>, %arg4: memref<64x1xf32, #tpu.memory_space<vmem>>, %arg5: memref<64x1xf32, #tpu.memory_space<vmem>>, %arg6: memref<64x64xf32, #tpu.memory_space<vmem>>, %arg7: memref<64x1xf32, #tpu.memory_space<vmem>>, %arg8: memref<64x1xf32, #tpu.memory_space<vmem>>, %arg9: memref<64x1xf32, #tpu.memory_space<vmem>>, %arg10: memref<16x64xf32, #tpu.memory_space<vmem>>, %arg11: memref<16x1xf32, #tpu.memory_space<vmem>>, %arg12: memref<16x8xf32, #tpu.memory_space<vmem>>) attributes {dimension_semantics = [#tpu.dimension_semantics<parallel>], iteration_bounds = array<i64: 1>, scalar_prefetch = 0 : i64, scratch_operands = 0 : i64, tpu.core_type = #tpu.core_type<tc>, window_params = [{transform_indices = @transform_0, window_bounds = array<i64: 32, 8>}, {pipeline_mode = #tpu.pipeline_mode<synchronous>, transform_indices = @transform_1, window_bounds = array<i64: 64, 32>}, {pipeline_mode = #tpu.pipeline_mode<synchronous>, transform_indices = @transform_2, window_bounds = array<i64: 64, 1>}, {pipeline_mode = #tpu.pipeline_mode<synchronous>, transform_indices = @transform_3, window_bounds = array<i64: 64, 1>}, {pipeline_mode = #tpu.pipeline_mode<synchronous>, transform_indices = @transform_4, window_bounds = array<i64: 64, 1>}, {pipeline_mode = #tpu.pipeline_mode<synchronous>, transform_indices = @transform_5, window_bounds = array<i64: 64, 64>}, {pipeline_mode = #tpu.pipeline_mode<synchronous>, transform_indices = @transform_6, window_bounds = array<i64: 64, 1>}, {pipeline_mode = #tpu.pipeline_mode<synchronous>, transform_indices = @transform_7, window_bounds = array<i64: 64, 1>}, {pipeline_mode = #tpu.pipeline_mode<synchronous>, transform_indices = @transform_8, window_bounds = array<i64: 64, 1>}, {pipeline_mode = #tpu.pipeline_mode<synchronous>, transform_indices = @transform_9, window_bounds = array<i64: 16, 64>}, {pipeline_mode = #tpu.pipeline_mode<synchronous>, transform_indices = @transform_10, window_bounds = array<i64: 16, 1>}, {transform_indices = @transform_11, window_bounds = array<i64: 16, 8>}]} {
    %c0 = arith.constant 0 : index
    %c0_0 = arith.constant 0 : index
    %0 = vector.load %arg1[%c0, %c0_0] : memref<32x8xf32, #tpu.memory_space<vmem>>, vector<32x8xf32>
    %c0_1 = arith.constant 0 : index
    %c0_2 = arith.constant 0 : index
    %1 = vector.load %arg2[%c0_1, %c0_2] : memref<64x32xf32, #tpu.memory_space<vmem>>, vector<64x32xf32>
    %cst = arith.constant dense<0.000000e+00> : vector<64x8xf32>
    %2 = tpu.matmul %1, %0, %cst {dimension_numbers = #tpu.dot_dimension_numbers<[1], [0], [0], [1], [0, 0, 1, 1], [], []>} : vector<64x32xf32>, vector<32x8xf32>, vector<64x8xf32> -> vector<64x8xf32>
    %c0_3 = arith.constant 0 : index
    %c0_4 = arith.constant 0 : index
    %3 = vector.load %arg3[%c0_3, %c0_4] : memref<64x1xf32, #tpu.memory_space<vmem>>, vector<64x1xf32>
    %4 = vector.broadcast %3 : vector<64x1xf32> to vector<64x8xf32>
    %5 = arith.addf %2, %4 : vector<64x8xf32>
    %c0_5 = arith.constant 0 : index
    %c0_6 = arith.constant 0 : index
    %6 = vector.load %arg4[%c0_5, %c0_6] : memref<64x1xf32, #tpu.memory_space<vmem>>, vector<64x1xf32>
    %c0_7 = arith.constant 0 : index
    %c0_8 = arith.constant 0 : index
    %7 = vector.load %arg5[%c0_7, %c0_8] : memref<64x1xf32, #tpu.memory_space<vmem>>, vector<64x1xf32>
    %cst_9 = arith.constant dense<0.000000e+00> : vector<8xf32>
    %8 = vector.multi_reduction <add>, %5, %cst_9 [0] : vector<64x8xf32> to vector<8xf32>
    %9 = vector.shape_cast %8 : vector<8xf32> to vector<1x8xf32>
    %cst_10 = arith.constant 1.562500e-02 : f32
    %10 = vector.broadcast %cst_10 : f32 to vector<1x8xf32>
    %11 = arith.mulf %9, %10 : vector<1x8xf32>
    %12 = vector.broadcast %11 : vector<1x8xf32> to vector<64x8xf32>
    %13 = arith.subf %5, %12 : vector<64x8xf32>
    %14 = arith.mulf %13, %13 : vector<64x8xf32>
    %cst_11 = arith.constant dense<0.000000e+00> : vector<8xf32>
    %15 = vector.multi_reduction <add>, %14, %cst_11 [0] : vector<64x8xf32> to vector<8xf32>
    %16 = vector.shape_cast %15 : vector<8xf32> to vector<1x8xf32>
    %cst_12 = arith.constant 1.562500e-02 : f32
    %17 = vector.broadcast %cst_12 : f32 to vector<1x8xf32>
    %18 = arith.mulf %16, %17 : vector<1x8xf32>
    %cst_13 = arith.constant 9.99999974E-6 : f32
    %19 = vector.broadcast %cst_13 : f32 to vector<1x8xf32>
    %20 = arith.addf %18, %19 : vector<1x8xf32>
    %21 = math.rsqrt %20 : vector<1x8xf32>
    %22 = vector.broadcast %21 : vector<1x8xf32> to vector<64x8xf32>
    %23 = arith.mulf %13, %22 : vector<64x8xf32>
    %24 = vector.broadcast %6 : vector<64x1xf32> to vector<64x8xf32>
    %25 = arith.mulf %23, %24 : vector<64x8xf32>
    %26 = vector.broadcast %7 : vector<64x1xf32> to vector<64x8xf32>
    %27 = arith.addf %25, %26 : vector<64x8xf32>
    %cst_14 = arith.constant 5.000000e-01 : f32
    %28 = vector.broadcast %cst_14 : f32 to vector<64x8xf32>
    %29 = arith.mulf %28, %27 : vector<64x8xf32>
    %cst_15 = arith.constant 0.707106769 : f32
    %30 = vector.broadcast %cst_15 : f32 to vector<64x8xf32>
    %31 = arith.mulf %27, %30 : vector<64x8xf32>
    %32 = math.erf %31 : vector<64x8xf32>
    %cst_16 = arith.constant 1.000000e+00 : f32
    %33 = vector.broadcast %cst_16 : f32 to vector<64x8xf32>
    %34 = arith.addf %33, %32 : vector<64x8xf32>
    %35 = arith.mulf %29, %34 : vector<64x8xf32>
    %c0_17 = arith.constant 0 : index
    %c0_18 = arith.constant 0 : index
    %36 = vector.load %arg6[%c0_17, %c0_18] : memref<64x64xf32, #tpu.memory_space<vmem>>, vector<64x64xf32>
    %cst_19 = arith.constant dense<0.000000e+00> : vector<64x8xf32>
    %37 = tpu.matmul %36, %35, %cst_19 {dimension_numbers = #tpu.dot_dimension_numbers<[1], [0], [0], [1], [0, 0, 1, 1], [], []>} : vector<64x64xf32>, vector<64x8xf32>, vector<64x8xf32> -> vector<64x8xf32>
    %c0_20 = arith.constant 0 : index
    %c0_21 = arith.constant 0 : index
    %38 = vector.load %arg7[%c0_20, %c0_21] : memref<64x1xf32, #tpu.memory_space<vmem>>, vector<64x1xf32>
    %39 = vector.broadcast %38 : vector<64x1xf32> to vector<64x8xf32>
    %40 = arith.addf %37, %39 : vector<64x8xf32>
    %c0_22 = arith.constant 0 : index
    %c0_23 = arith.constant 0 : index
    %41 = vector.load %arg8[%c0_22, %c0_23] : memref<64x1xf32, #tpu.memory_space<vmem>>, vector<64x1xf32>
    %c0_24 = arith.constant 0 : index
    %c0_25 = arith.constant 0 : index
    %42 = vector.load %arg9[%c0_24, %c0_25] : memref<64x1xf32, #tpu.memory_space<vmem>>, vector<64x1xf32>
    %cst_26 = arith.constant dense<0.000000e+00> : vector<8xf32>
    %43 = vector.multi_reduction <add>, %40, %cst_26 [0] : vector<64x8xf32> to vector<8xf32>
    %44 = vector.shape_cast %43 : vector<8xf32> to vector<1x8xf32>
    %cst_27 = arith.constant 1.562500e-02 : f32
    %45 = vector.broadcast %cst_27 : f32 to vector<1x8xf32>
    %46 = arith.mulf %44, %45 : vector<1x8xf32>
    %47 = vector.broadcast %46 : vector<1x8xf32> to vector<64x8xf32>
    %48 = arith.subf %40, %47 : vector<64x8xf32>
    %49 = arith.mulf %48, %48 : vector<64x8xf32>
    %cst_28 = arith.constant dense<0.000000e+00> : vector<8xf32>
    %50 = vector.multi_reduction <add>, %49, %cst_28 [0] : vector<64x8xf32> to vector<8xf32>
    %51 = vector.shape_cast %50 : vector<8xf32> to vector<1x8xf32>
    %cst_29 = arith.constant 1.562500e-02 : f32
    %52 = vector.broadcast %cst_29 : f32 to vector<1x8xf32>
    %53 = arith.mulf %51, %52 : vector<1x8xf32>
    %cst_30 = arith.constant 9.99999974E-6 : f32
    %54 = vector.broadcast %cst_30 : f32 to vector<1x8xf32>
    %55 = arith.addf %53, %54 : vector<1x8xf32>
    %56 = math.rsqrt %55 : vector<1x8xf32>
    %57 = vector.broadcast %56 : vector<1x8xf32> to vector<64x8xf32>
    %58 = arith.mulf %48, %57 : vector<64x8xf32>
    %59 = vector.broadcast %41 : vector<64x1xf32> to vector<64x8xf32>
    %60 = arith.mulf %58, %59 : vector<64x8xf32>
    %61 = vector.broadcast %42 : vector<64x1xf32> to vector<64x8xf32>
    %62 = arith.addf %60, %61 : vector<64x8xf32>
    %cst_31 = arith.constant 5.000000e-01 : f32
    %63 = vector.broadcast %cst_31 : f32 to vector<64x8xf32>
    %64 = arith.mulf %63, %62 : vector<64x8xf32>
    %cst_32 = arith.constant 0.707106769 : f32
    %65 = vector.broadcast %cst_32 : f32 to vector<64x8xf32>
    %66 = arith.mulf %62, %65 : vector<64x8xf32>
    %67 = math.erf %66 : vector<64x8xf32>
    %cst_33 = arith.constant 1.000000e+00 : f32
    %68 = vector.broadcast %cst_33 : f32 to vector<64x8xf32>
    %69 = arith.addf %68, %67 : vector<64x8xf32>
    %70 = arith.mulf %64, %69 : vector<64x8xf32>
    %c0_34 = arith.constant 0 : index
    %c0_35 = arith.constant 0 : index
    %71 = vector.load %arg10[%c0_34, %c0_35] : memref<16x64xf32, #tpu.memory_space<vmem>>, vector<16x64xf32>
    %cst_36 = arith.constant dense<0.000000e+00> : vector<16x8xf32>
    %72 = tpu.matmul %71, %70, %cst_36 {dimension_numbers = #tpu.dot_dimension_numbers<[1], [0], [0], [1], [0, 0, 1, 1], [], []>} : vector<16x64xf32>, vector<64x8xf32>, vector<16x8xf32> -> vector<16x8xf32>
    %c0_37 = arith.constant 0 : index
    %c0_38 = arith.constant 0 : index
    %73 = vector.load %arg11[%c0_37, %c0_38] : memref<16x1xf32, #tpu.memory_space<vmem>>, vector<16x1xf32>
    %74 = vector.broadcast %73 : vector<16x1xf32> to vector<16x8xf32>
    %75 = arith.addf %72, %74 : vector<16x8xf32>
    %76 = vector.extract_strided_slice %75 {offsets = [0, 0], sizes = [8, 8], strides = [1, 1]} : vector<16x8xf32> to vector<8x8xf32>
    %c0_39 = arith.constant 0 : index
    %c0_40 = arith.constant 0 : index
    %77 = vector.load %arg12[%c0_39, %c0_40] : memref<16x8xf32, #tpu.memory_space<vmem>>, vector<8x8xf32>
    tpu.vector_store %arg12[%c0_39, %c0_40], %76 {strides = array<i32>} : memref<16x8xf32, #tpu.memory_space<vmem>>, vector<8x8xf32>,
    %78 = vector.extract_strided_slice %75 {offsets = [8, 0], sizes = [8, 8], strides = [1, 1]} : vector<16x8xf32> to vector<8x8xf32>
    %79 = math.exp %78 : vector<8x8xf32>
    %c8 = arith.constant 8 : index
    %c0_41 = arith.constant 0 : index
    %80 = vector.load %arg12[%c8, %c0_41] : memref<16x8xf32, #tpu.memory_space<vmem>>, vector<8x8xf32>
    tpu.vector_store %arg12[%c8, %c0_41], %79 {strides = array<i32>} : memref<16x8xf32, #tpu.memory_space<vmem>>, vector<8x8xf32>,
    return
  }
  func.func @transform_0(%arg0: i32) -> (i32, i32) {
    %c0_i32 = arith.constant 0 : i32
    %c0_i32_0 = arith.constant 0 : i32
    return %c0_i32, %arg0 : i32, i32
  }
  func.func @transform_1(%arg0: i32) -> (i32, i32) {
    %c0_i32 = arith.constant 0 : i32
    %c0_i32_0 = arith.constant 0 : i32
    %c0_i32_1 = arith.constant 0 : i32
    return %c0_i32, %c0_i32_0 : i32, i32
  }
  func.func @transform_2(%arg0: i32) -> (i32, i32) {
    %c0_i32 = arith.constant 0 : i32
    %c0_i32_0 = arith.constant 0 : i32
    %c0_i32_1 = arith.constant 0 : i32
    return %c0_i32, %c0_i32_0 : i32, i32
  }
  func.func @transform_3(%arg0: i32) -> (i32, i32) {
    %c0_i32 = arith.constant 0 : i32
    %c0_i32_0 = arith.constant 0 : i32
    %c0_i32_1 = arith.constant 0 : i32
    return %c0_i32, %c0_i32_0 : i32, i32
  }
  func.func @transform_4(%arg0: i32) -> (i32, i32) {
    %c0_i32 = arith.constant 0 : i32
    %c0_i32_0 = arith.constant 0 : i32
    %c0_i32_1 = arith.constant 0 : i32
    return %c0_i32, %c0_i32_0 : i32, i32
  }
  func.func @transform_5(%arg0: i32) -> (i32, i32) {
    %c0_i32 = arith.constant 0 : i32
    %c0_i32_0 = arith.constant 0 : i32
    %c0_i32_1 = arith.constant 0 : i32
    return %c0_i32, %c0_i32_0 : i32, i32
  }
  func.func @transform_6(%arg0: i32) -> (i32, i32) {
    %c0_i32 = arith.constant 0 : i32
    %c0_i32_0 = arith.constant 0 : i32
    %c0_i32_1 = arith.constant 0 : i32
    return %c0_i32, %c0_i32_0 : i32, i32
  }
  func.func @transform_7(%arg0: i32) -> (i32, i32) {
    %c0_i32 = arith.constant 0 : i32
    %c0_i32_0 = arith.constant 0 : i32
    %c0_i32_1 = arith.constant 0 : i32
    return %c0_i32, %c0_i32_0 : i32, i32
  }
  func.func @transform_8(%arg0: i32) -> (i32, i32) {
    %c0_i32 = arith.constant 0 : i32
    %c0_i32_0 = arith.constant 0 : i32
    %c0_i32_1 = arith.constant 0 : i32
    return %c0_i32, %c0_i32_0 : i32, i32
  }
  func.func @transform_9(%arg0: i32) -> (i32, i32) {
    %c0_i32 = arith.constant 0 : i32
    %c0_i32_0 = arith.constant 0 : i32
    %c0_i32_1 = arith.constant 0 : i32
    return %c0_i32, %c0_i32_0 : i32, i32
  }
  func.func @transform_10(%arg0: i32) -> (i32, i32) {
    %c0_i32 = arith.constant 0 : i32
    %c0_i32_0 = arith.constant 0 : i32
    %c0_i32_1 = arith.constant 0 : i32
    return %c0_i32, %c0_i32_0 : i32, i32
  }
  func.func @transform_11(%arg0: i32) -> (i32, i32) {
    %c0_i32 = arith.constant 0 : i32
    %c0_i32_0 = arith.constant 0 : i32
    return %c0_i32, %arg0 : i32, i32
  }
}

</mosaic_0001>

<bundles_post_ra>
// kernel: tpu_custom_call.1
= control target key start
LH: loop header
LB: loop body
LE: loop exit
PB: predicated region body
PF: predicated region fallthrough
CT: control target
= control target key end

     0   :  { %v1166_v0 = vmov 0   ;;  %vm98_vm0 = vcmask 261120   ;;  %vm507_vm1 = vcmask 523264   ;;  %vm244_vm2 = vcmask 64512   ;;  %s1501_s2 = inlined_call_operand.vmem [shape: f32[64,1], index: 2, kind: input, shape index: {}]   ;;  %s1502_s0 = inlined_call_operand.vmem [shape: f32[32,8], index: 0, kind: input, shape index: {}]   ;;  %s1503_s1 = inlined_call_operand.vmem [shape: f32[64,32], index: 1, kind: input, shape index: {}]   ;;  %s1504_s3 = inlined_call_operand.vmem [shape: f32[64,1], index: 3, kind: input, shape index: {}]   ;;  %s1505_s4 = inlined_call_operand.vmem [shape: f32[64,1], index: 4, kind: input, shape index: {}]   ;;  %s1506_s6 = inlined_call_operand.vmem [shape: f32[64,1], index: 6, kind: input, shape index: {}]   ;;  %s1507_s7 = inlined_call_operand.vmem [shape: f32[64,1], index: 7, kind: input, shape index: {}]   ;;  %s1508_s8 = inlined_call_operand.vmem [shape: f32[64,1], index: 8, kind: input, shape index: {}]   ;;  %s1509_s10 = inlined_call_operand.vmem [shape: f32[16,1], index: 10, kind: input, shape index: {}]   ;;  %s1510_s5 = inlined_call_operand.vmem [shape: f32[64,64], index: 5, kind: input, shape index: {}]   ;;  %s1511_s9 = inlined_call_operand.vmem [shape: f32[16,64], index: 9, kind: input, shape index: {}]   ;;  %s1512_s11 = inlined_call_operand.vmem [shape: f32[16,8], index: 11, kind: output, shape index: {}]  }
   0x1   :  { %1126 = vset.pattern.permute.xlu0 %v1166_v0  ;;  %1127 = vset.pattern.permute.xlu1 %v1166_v0  ;;  %v50_v1 = vld [vmem:[%s1501_s2] sm:$0xff]  ;;  %v52_v2 = vld [vmem:[%s1501_s2 + $0x10] sm:$0xff]  ;;  %v39_v4 = vld [vmem:[%s1502_s0 + $0x8] sm:$0xff] }
   0x2   :  { %v38_v3 = vld [vmem:[%s1502_s0] sm:$0xff]  ;;  %60 = vperm.xlu0 %1126, %v50_v1   ;;  %70 = vperm.xlu1 %1127, %v52_v2   ;;  %v51_v6 = vld [vmem:[%s1501_s2 + $0x8] sm:$0xff]  ;;  %v40_v7 = vld [vmem:[%s1502_s0 + $0x10] sm:$0xff] }
   0x3   :  { %v1085_v5 = vpack.c.bf16 %v39_v4, %v38_v3  ;;  %v41_v8 = vld [vmem:[%s1502_s0 + $0x18] sm:$0xff]  ;;  %v42_v11 = vld [vmem:[%s1503_s1] sm:$0xff]  ;;  %v55_v13 = vld [vmem:[%s1501_s2 + $0x28] sm:$0xff] }
   0x4   :  { %v53_v9 = vld [vmem:[%s1501_s2 + $0x18] sm:$0xff]  ;;  %v1089_v10 = vpack.c.bf16 %v41_v8, %v40_v7  ;;  %1026 = vmatprep.mubr.msk.f32.mxu0 %vm98_vm0, %v42_v11  ;;  %v54_v12 = vld [vmem:[%s1501_s2 + $0x20] sm:$0xff]  ;;  %v43_v14 = vld [vmem:[%s1503_s1 + $0x8] sm:$0xff] }
   0x5   :  { %1086 = vmatprep.subr.bf16.mxu0 %v1085_v5  ;;  %v56_v15 = vld [vmem:[%s1501_s2 + $0x30] sm:$0xff]  ;;  %v57_v17 = vld [vmem:[%s1501_s2 + $0x38] sm:$0xff]  ;;  %v228_v19 = vld [vmem:[%s1504_s3] sm:$0xff] }
   0x6   :  { %1088 = vmatpush3.bf16.msra.mxu0 %v1085_v5  ;;  %65 = vperm.xlu0 %1126, %v51_v6   ;;  %v44_v16 = vld [vmem:[%s1503_s1 + $0x10] sm:$0xff]  ;;  %v45_v18 = vld [vmem:[%s1503_s1 + $0x18] sm:$0xff]  ;;  %v46_v20 = vld [vmem:[%s1503_s1 + $0x20] sm:$0xff] }
   0x7   :  { %75 = vperm.xlu1 %1127, %v53_v9   ;;  %1090 = vmatprep.subr.bf16.mxu0 %v1089_v10  ;;  %v229_v21 = vld [vmem:[%s1504_s3 + $0x8] sm:$0xff]  ;;  %v236_v23 = vld [vmem:[%s1505_s4] sm:$0xff]  ;;  %v48_v24 = vld [vmem:[%s1503_s1 + $0x30] sm:$0xff] }
   0x8   :  { %v47_v22 = vld [vmem:[%s1503_s1 + $0x28] sm:$0xff]  ;;  %v49_v26 = vld [vmem:[%s1503_s1 + $0x38] sm:$0xff]  ;;  %v230_v27 = vld [vmem:[%s1504_s3 + $0x10] sm:$0xff] }
   0x9   :  { %v237_v25 = vld [vmem:[%s1505_s4 + $0x8] sm:$0xff]  ;;  %v231_v28 = vld [vmem:[%s1504_s3 + $0x18] sm:$0xff]  ;;  %v238_v29 = vld [vmem:[%s1505_s4 + $0x10] sm:$0xff] }
   0xa   :  { %1092 = vmatpush3.bf16.msra.mxu0 %v1089_v10  ;;  %80 = vperm.xlu0 %1126, %v54_v12   ;;  %v239_v30 = vld [vmem:[%s1505_s4 + $0x18] sm:$0xff]  ;;  %v232_v31 = vld [vmem:[%s1504_s3 + $0x20] sm:$0xff]  ;;  %v233_v32 = vld [vmem:[%s1504_s3 + $0x28] sm:$0xff] }
   0xb   :  { %85 = vperm.xlu1 %1127, %v55_v13   ;;  %v240_v33 = vld [vmem:[%s1505_s4 + $0x20] sm:$0xff]  ;;  %v241_v34 = vld [vmem:[%s1505_s4 + $0x28] sm:$0xff]  ;;  %v234_v35 = vld [vmem:[%s1504_s3 + $0x30] sm:$0xff] }
   0xc   :  { %v235_v36 = vld [vmem:[%s1504_s3 + $0x38] sm:$0xff]  ;;  %v242_v37 = vld [vmem:[%s1505_s4 + $0x30] sm:$0xff]  ;;  %v459_v39 = vld [vmem:[%s1506_s6] sm:$0xff] }
   0xd   :  { %1027 = vmatmul.mubr.msk.f32.vlgmr.msra.gmra.mrb[0].mxu0 %vm98_vm0, %v43_v14  ;;  %v243_v38 = vld [vmem:[%s1505_s4 + $0x38] sm:$0xff]  ;;  %v460_v40 = vld [vmem:[%s1506_s6 + $0x8] sm:$0xff]  ;;  %v461_v41 = vld [vmem:[%s1506_s6 + $0x10] sm:$0xff] }
   0xe   :  { %90 = vperm.xlu0 %1126, %v56_v15   ;;  %1029 = vmatprep.mubr.msk.f32.mxu0 %vm98_vm0, %v44_v16  ;;  %v462_v42 = vld [vmem:[%s1506_s6 + $0x18] sm:$0xff]  ;;  %v463_v43 = vld [vmem:[%s1506_s6 + $0x20] sm:$0xff]  ;;  %v464_v44 = vld [vmem:[%s1506_s6 + $0x28] sm:$0xff] }
   0xf   :  { %95 = vperm.xlu1 %1127, %v57_v17   ;;  %v465_v45 = vld [vmem:[%s1506_s6 + $0x30] sm:$0xff]  ;;  %v466_v46 = vld [vmem:[%s1506_s6 + $0x38] sm:$0xff]  ;;  %v637_v47 = vld [vmem:[%s1507_s7] sm:$0xff] }
  0x10   :  { %v638_v48 = vld [vmem:[%s1507_s7 + $0x8] sm:$0xff]  ;;  %v645_v49 = vld [vmem:[%s1508_s8] sm:$0xff]  ;;  %v639_v51 = vld [vmem:[%s1507_s7 + $0x10] sm:$0xff] }
  0x11   :  { %1030 = vmatmul.mubr.msk.f32.gmra.mrb[2].mxu0 %vm98_vm0, %v45_v18  ;;  %v646_v50 = vld [vmem:[%s1508_s8 + $0x8] sm:$0xff]  ;;  %v640_v52 = vld [vmem:[%s1507_s7 + $0x18] sm:$0xff]  ;;  %v647_v53 = vld [vmem:[%s1508_s8 + $0x10] sm:$0xff] }
  0x12   :  { %317 = vperm.xlu0 %1126, %v228_v19   ;;  %1032 = vmatprep.mubr.msk.f32.mxu0 %vm98_vm0, %v46_v20  ;;  %v648_v54 = vld [vmem:[%s1508_s8 + $0x18] sm:$0xff]  ;;  %v641_v55 = vld [vmem:[%s1507_s7 + $0x20] sm:$0xff]  ;;  %v642_v56 = vld [vmem:[%s1507_s7 + $0x28] sm:$0xff] }
  0x13   :  { %322 = vperm.xlu1 %1127, %v229_v21   ;;  %v649_v57 = vld [vmem:[%s1508_s8 + $0x20] sm:$0xff]  ;;  %v650_v58 = vld [vmem:[%s1508_s8 + $0x28] sm:$0xff]  ;;  %v643_v59 = vld [vmem:[%s1507_s7 + $0x30] sm:$0xff] }
  0x14   :  { %v644_v60 = vld [vmem:[%s1507_s7 + $0x38] sm:$0xff]  ;;  %v651_v61 = vld [vmem:[%s1508_s8 + $0x30] sm:$0xff]  ;;  %v862_v63 = vld [vmem:[%s1509_s10 + $0x8] sm:$0xff] }
  0x15   :  { %1033 = vmatmul.mubr.msk.f32.gmra.mrb[4].mxu0 %vm98_vm0, %v47_v22  ;;  %v652_v62 = vld [vmem:[%s1508_s8 + $0x38] sm:$0xff]  ;;  %v861_v0 = vld [vmem:[%s1509_s10] sm:$0xff] }
  0x16   :  { %365 = vperm.xlu0 %1126, %v236_v23   ;;  %1035 = vmatprep.mubr.msk.f32.mxu0 %vm98_vm0, %v48_v24  ;;  %v451_v1 = vld [vmem:[%s1510_s5] sm:$0xff] }
  0x17   :  { %370 = vperm.xlu1 %1127, %v237_v25   ;;  %1054 = vmatprep.mubr.msk.f32.mxu1 %vm507_vm1, %v451_v1 }
  0x19   :  { %1036 = vmatmul.mubr.msk.f32.gmra.mrb[6].mxu0 %vm98_vm0, %v49_v26 }
  0x1a   :  { %327 = vperm.xlu0 %1126, %v230_v27  }
  0x1b   :  { %332 = vperm.xlu1 %1127, %v231_v28  }
  0x1e   :  { %375 = vperm.xlu0 %1126, %v238_v29  }
  0x1f   :  { %380 = vperm.xlu1 %1127, %v239_v30  }
  0x22   :  { %337 = vperm.xlu0 %1126, %v232_v31  }
  0x23   :  { %342 = vperm.xlu1 %1127, %v233_v32  }
  0x26   :  { %385 = vperm.xlu0 %1126, %v240_v33  }
  0x27   :  { %390 = vperm.xlu1 %1127, %v241_v34  }
  0x2a   :  { %347 = vperm.xlu0 %1126, %v234_v35  }
  0x2b   :  { %352 = vperm.xlu1 %1127, %v235_v36  }
  0x2e   :  { %395 = vperm.xlu0 %1126, %v242_v37  }
  0x2f   :  { %400 = vperm.xlu1 %1127, %v243_v38  }
  0x32   :  { %469 = vperm.xlu0 %1126, %v459_v39  }
  0x33   :  { %474 = vperm.xlu1 %1127, %v460_v40  }
  0x36   :  { %479 = vperm.xlu0 %1126, %v461_v41  }
  0x37   :  { %484 = vperm.xlu1 %1127, %v462_v42  }
  0x3a   :  { %489 = vperm.xlu0 %1126, %v463_v43  }
  0x3b   :  { %494 = vperm.xlu1 %1127, %v464_v44  }
  0x3e   :  { %499 = vperm.xlu0 %1126, %v465_v45  }
  0x3f   :  { %504 = vperm.xlu1 %1127, %v466_v46  }
  0x42   :  { %725 = vperm.xlu0 %1126, %v637_v47  }
  0x43   :  { %730 = vperm.xlu1 %1127, %v638_v48  }
  0x46   :  { %773 = vperm.xlu0 %1126, %v645_v49  }
  0x47   :  { %778 = vperm.xlu1 %1127, %v646_v50  }
  0x4a   :  { %735 = vperm.xlu0 %1126, %v639_v51  }
  0x4b   :  { %740 = vperm.xlu1 %1127, %v640_v52  }
  0x4e   :  { %783 = vperm.xlu0 %1126, %v647_v53  }
  0x4f   :  { %788 = vperm.xlu1 %1127, %v648_v54  }
  0x52   :  { %745 = vperm.xlu0 %1126, %v641_v55  }
  0x53   :  { %750 = vperm.xlu1 %1127, %v642_v56  }
  0x56   :  { %793 = vperm.xlu0 %1126, %v649_v57  }
  0x57   :  { %798 = vperm.xlu1 %1127, %v650_v58  }
  0x5a   :  { %755 = vperm.xlu0 %1126, %v643_v59  }
  0x5b   :  { %760 = vperm.xlu1 %1127, %v644_v60  }
  0x5e   :  { %803 = vperm.xlu0 %1126, %v651_v61  }
  0x5f   :  { %808 = vperm.xlu1 %1127, %v652_v62  }
  0x62   :  { %870 = vperm.xlu0 %1126, %v862_v63  }
  0x63   :  { %865 = vperm.xlu1 %1127, %v861_v0  }
  0x81   :  { %v61_v2 = vpop.permute.xlu0 %60  ;;  %v71_v3 = vpop.permute.xlu1 %70 }
  0x85   :  { %v66_v4 = vpop.permute.xlu0 %65 }
  0x86   :  { %v76_v6 = vpop.permute.xlu1 %75 }
  0x89   :  { %v81_v15 = vpop.permute.xlu0 %80 }
  0x8a   :  { %v86_v18 = vpop.permute.xlu1 %85 }
  0x8d   :  { %v91_v27 = vpop.permute.xlu0 %90 }
  0x8e   :  { %v96_v30 = vpop.permute.xlu1 %95 }
  0xe0   :  { %v1028_v5 = vpop.f32.mrb[0].mxu0 }
  0xe1   :  { %v195_v7 = vadd.f32 %v1028_v5, %v66_v4  ;;  %v189_v8 = vpop.f32.mrb[1].mxu0  ;;  %v318_v4 = vpop.permute.xlu0 %317 }
  0xe2   :  { %v190_v9 = vadd.f32 %v189_v8, %v61_v2 }
  0xe3   :  { %v246_v10 = vsel %vm244_vm2, %v195_v7, 0.0 }
  0xe4   :  { %v245_v11 = vsel %vm244_vm2, %v190_v9, 0.0  ;;  %v1031_v12 = vpop.f32.mrb[2].mxu0 }
  0xe5   :  { %v247_v13 = vadd.f32 %v246_v10, %v245_v11  ;;  %v199_v14 = vpop.f32.mrb[3].mxu0  ;;  %v205_v16 = vadd.f32 %v1031_v12, %v76_v6  ;;  %v323_v6 = vpop.permute.xlu1 %322 }
  0xe6   :  { %v200_v17 = vadd.f32 %v199_v14, %v71_v3  ;;  %v366_v14 = vpop.permute.xlu0 %365 }
  0xe7   :  { %v250_v23 = vsel %vm244_vm2, %v205_v16, 0.0 }
  0xe8   :  { %v248_v19 = vsel %vm244_vm2, %v200_v17, 0.0  ;;  %v1034_v20 = vpop.f32.mrb[4].mxu0 }
  0xe9   :  { %v249_v21 = vadd.f32 %v248_v19, %v247_v13  ;;  %v209_v22 = vpop.f32.mrb[5].mxu0  ;;  %v215_v24 = vadd.f32 %v1034_v20, %v86_v18 }
  0xea   :  { %v210_v25 = vadd.f32 %v209_v22, %v81_v15  ;;  %v328_v20 = vpop.permute.xlu0 %327 }
  0xeb   :  { %v251_v26 = vadd.f32 %v250_v23, %v249_v21  ;;  %v254_v33 = vsel %vm244_vm2, %v215_v24, 0.0 }
  0xec   :  { %v252_v28 = vsel %vm244_vm2, %v210_v25, 0.0  ;;  %v1037_v29 = vpop.f32.mrb[6].mxu0 }
  0xed   :  { %v253_v31 = vadd.f32 %v252_v28, %v251_v26  ;;  %v219_v32 = vpop.f32.mrb[7].mxu0  ;;  %v225_v34 = vadd.f32 %v1037_v29, %v96_v30 }
  0xee   :  { %v220_v35 = vadd.f32 %v219_v32, %v91_v27 }
  0xef   :  { %v255_v36 = vadd.f32 %v254_v33, %v253_v31  ;;  %v258_v39 = vsel %vm244_vm2, %v225_v34, 0.0 }
  0xf0   :  { %v256_v37 = vsel %vm244_vm2, %v220_v35, 0.0 }
  0xf1   :  { %v257_v38 = vadd.f32 %v256_v37, %v255_v36 }
  0xf3   :  { %v259_v40 = vadd.f32 %v258_v39, %v257_v38 }
  0xf5   :  { %v260_v41 = vrot.slane %v259_v40, 4 }
  0xf7   :  { %v261_v42 = vadd.f32 %v260_v41, %v259_v40 }
  0xf9   :  { %v262_v43 = vrot.slane %v261_v42, 2 }
  0xfb   :  { %v263_v44 = vadd.f32 %v262_v43, %v261_v42 }
  0xfd   :  { %v264_v45 = vrot.slane %v263_v44, 1 }
  0xff   :  { %v265_v46 = vadd.f32 %v264_v45, %v263_v44 }
 0x101   :  { %v266_v47 = vmul.f32 0.015625, %v265_v46 }
 0x103   :  { %v267_v48 = vsub.f32 %v190_v9, %v266_v47  ;;  %v268_v49 = vsub.f32 %v195_v7, %v266_v47  ;;  %v269_v50 = vsub.f32 %v200_v17, %v266_v47  ;;  %v270_v51 = vsub.f32 %v205_v16, %v266_v47  ;;  %v371_v16 = vpop.permute.xlu1 %370 }
 0x104   :  { %v271_v52 = vsub.f32 %v210_v25, %v266_v47  ;;  %v272_v53 = vsub.f32 %v215_v24, %v266_v47  ;;  %v273_v54 = vsub.f32 %v220_v35, %v266_v47  ;;  %v274_v55 = vsub.f32 %v225_v34, %v266_v47  ;;  %v376_v25 = vpop.permute.xlu0 %375 }
 0x105   :  { %v275_v56 = vmul.f32 %v267_v48, %v267_v48  ;;  %v276_v57 = vmul.f32 %v268_v49, %v268_v49  ;;  %v277_v58 = vmul.f32 %v269_v50, %v269_v50  ;;  %v278_v59 = vmul.f32 %v270_v51, %v270_v51 }
 0x106   :  { %v279_v63 = vmul.f32 %v271_v52, %v271_v52  ;;  %v280_v2 = vmul.f32 %v272_v53, %v272_v53  ;;  %v281_v7 = vmul.f32 %v273_v54, %v273_v54  ;;  %v282_v10 = vmul.f32 %v274_v55, %v274_v55 }
 0x107   :  { %v283_v60 = vsel %vm244_vm2, %v275_v56, 0.0  ;;  %v284_v61 = vsel %vm244_vm2, %v276_v57, 0.0  ;;  %v286_v0 = vsel %vm244_vm2, %v277_v58, 0.0  ;;  %v288_v3 = vsel %vm244_vm2, %v278_v59, 0.0  ;;  %v333_v22 = vpop.permute.xlu1 %332 }
 0x108   :  { %v285_v62 = vadd.f32 %v284_v61, %v283_v60  ;;  %v290_v8 = vsel %vm244_vm2, %v279_v63, 0.0  ;;  %v292_v11 = vsel %vm244_vm2, %v280_v2, 0.0  ;;  %v294_v13 = vsel %vm244_vm2, %v281_v7, 0.0  ;;  %v338_v30 = vpop.permute.xlu0 %337 }
 0x109   :  { %v296_v17 = vsel %vm244_vm2, %v282_v10, 0.0 }
 0x10a   :  { %v287_v1 = vadd.f32 %v286_v0, %v285_v62 }
 0x10b   :  { %v381_v27 = vpop.permute.xlu1 %380 }
 0x10c   :  { %v289_v5 = vadd.f32 %v288_v3, %v287_v1  ;;  %v386_v33 = vpop.permute.xlu0 %385 }
 0x10e   :  { %v291_v9 = vadd.f32 %v290_v8, %v289_v5 }
 0x10f   :  { %v343_v32 = vpop.permute.xlu1 %342 }
 0x110   :  { %v293_v12 = vadd.f32 %v292_v11, %v291_v9  ;;  %v348_v36 = vpop.permute.xlu0 %347 }
 0x112   :  { %v295_v15 = vadd.f32 %v294_v13, %v293_v12 }
 0x113   :  { %v391_v34 = vpop.permute.xlu1 %390 }
 0x114   :  { %v297_v18 = vadd.f32 %v296_v17, %v295_v15  ;;  %v396_v1 = vpop.permute.xlu0 %395 }
 0x116   :  { %v298_v19 = vrot.slane %v297_v18, 4 }
 0x117   :  { %v353_v37 = vpop.permute.xlu1 %352 }
 0x118   :  { %v299_v21 = vadd.f32 %v298_v19, %v297_v18 }
 0x11a   :  { %v300_v23 = vrot.slane %v299_v21, 2 }
 0x11c   :  { %v301_v24 = vadd.f32 %v300_v23, %v299_v21 }
 0x11e   :  { %v302_v26 = vrot.slane %v301_v24, 1 }
 0x120   :  { %v303_v28 = vadd.f32 %v302_v26, %v301_v24 }
 0x122   :  { %v304_v29 = vmul.f32 0.015625, %v303_v28 }
 0x124   :  { %v305_v31 = vadd.f32 1e-05, %v304_v29 }
 0x126   :  { %1128 = vrsqrt.f32 %v305_v31 }
 0x130   :  { %v1129_v35 = vpop.eup %1128 }
 0x131   :  { %v313_v38 = vmul.f32 %v1129_v35, %v273_v54  ;;  %v307_v39 = vmul.f32 %v1129_v35, %v267_v48  ;;  %v308_v40 = vmul.f32 %v1129_v35, %v268_v49  ;;  %v309_v41 = vmul.f32 %v1129_v35, %v269_v50  ;;  %v401_v50 = vpop.permute.xlu1 %400 }
 0x132   :  { %v310_v42 = vmul.f32 %v1129_v35, %v270_v51  ;;  %v311_v43 = vmul.f32 %v1129_v35, %v271_v52  ;;  %v312_v44 = vmul.f32 %v1129_v35, %v272_v53  ;;  %v314_v45 = vmul.f32 %v1129_v35, %v274_v55 }
 0x133   :  { %v361_v46 = vmul.f32 %v348_v36, %v313_v38  ;;  %v355_v47 = vmul.f32 %v318_v4, %v307_v39  ;;  %v356_v56 = vmul.f32 %v323_v6, %v308_v40  ;;  %v357_v57 = vmul.f32 %v328_v20, %v309_v41 }
 0x134   :  { %v358_v58 = vmul.f32 %v333_v22, %v310_v42  ;;  %v359_v59 = vmul.f32 %v338_v30, %v311_v43  ;;  %v360_v60 = vmul.f32 %v343_v32, %v312_v44  ;;  %v362_v61 = vmul.f32 %v353_v37, %v314_v45  ;;  %v452_v44 = vld [vmem:[%s1510_s5 + $0x8] sm:$0xff]  ;;  %v453_v45 = vld [vmem:[%s1510_s5 + $0x10] sm:$0xff] }
 0x135   :  { %v403_v62 = vadd.f32 %v366_v14, %v355_v47  ;;  %v404_v63 = vadd.f32 %v371_v16, %v356_v56  ;;  %v405_v0 = vadd.f32 %v376_v25, %v357_v57  ;;  %v409_v51 = vadd.f32 %v396_v1, %v361_v46  ;;  %v454_v46 = vld [vmem:[%s1510_s5 + $0x18] sm:$0xff]  ;;  %v455_v47 = vld [vmem:[%s1510_s5 + $0x20] sm:$0xff]  ;;  %v456_v56 = vld [vmem:[%s1510_s5 + $0x28] sm:$0xff] }
 0x136   :  { %v406_v54 = vadd.f32 %v381_v27, %v358_v58  ;;  %v407_v48 = vadd.f32 %v386_v33, %v359_v59  ;;  %v408_v49 = vadd.f32 %v391_v34, %v360_v60  ;;  %v410_v2 = vadd.f32 %v401_v50, %v362_v61  ;;  %v457_v57 = vld [vmem:[%s1510_s5 + $0x30] sm:$0xff]  ;;  %v458_v58 = vld [vmem:[%s1510_s5 + $0x38] sm:$0xff]  ;;  %v859_v59 = vld [vmem:[%s1511_s9] sm:$0xff]  ;;  %v470_v60 = vpop.permute.xlu0 %469  ;;  %v475_v61 = vpop.permute.xlu1 %474 }
 0x137   :  { %v419_v52 = vmul.f32 0.70710677, %v403_v62  ;;  %v420_v53 = vmul.f32 0.70710677, %v404_v63  ;;  %v421_v55 = vmul.f32 0.70710677, %v405_v0  ;;  %1082 = vmatprep.mubr.msk.f32.mxu0 %vm507_vm1, %v859_v59 }
 0x138   :  { %v422_v3 = vmul.f32 0.70710677, %v406_v54  ;;  %v423_v4 = vmul.f32 0.70710677, %v407_v48  ;;  %v424_v5 = vmul.f32 0.70710677, %v408_v49 }
 0x139   :  { %1130 = verf.f32 %v419_v52  ;;  %v425_v6 = vmul.f32 0.70710677, %v409_v51  ;;  %v426_v7 = vmul.f32 0.70710677, %v410_v2  ;;  %v411_v10 = vmul.f32 0.5, %v403_v62 }
 0x13a   :  { %1132 = verf.f32 %v420_v53  ;;  %v412_v13 = vmul.f32 0.5, %v404_v63  ;;  %v413_v17 = vmul.f32 0.5, %v405_v0  ;;  %v414_v21 = vmul.f32 0.5, %v406_v54  ;;  %v480_v62 = vpop.permute.xlu0 %479  ;;  %v485_v0 = vpop.permute.xlu1 %484 }
 0x13b   :  { %1134 = verf.f32 %v421_v55  ;;  %v415_v25 = vmul.f32 0.5, %v407_v48  ;;  %v416_v30 = vmul.f32 0.5, %v408_v49  ;;  %v417_v34 = vmul.f32 0.5, %v409_v51 }
 0x13c   :  { %1136 = verf.f32 %v422_v3  ;;  %v418_v38 = vmul.f32 0.5, %v410_v2 }
 0x13d   :  { %1138 = verf.f32 %v423_v4 }
 0x13e   :  { %1140 = verf.f32 %v424_v5  ;;  %v490_v55 = vpop.permute.xlu0 %489  ;;  %v495_v4 = vpop.permute.xlu1 %494 }
 0x13f   :  { %1142 = verf.f32 %v425_v6 }
 0x140   :  { %1144 = verf.f32 %v426_v7 }
 0x143   :  { %v1131_v8 = vpop.eup %1130 }
 0x144   :  { %v1133_v9 = vpop.eup %1132  ;;  %v435_v11 = vadd.f32 1.0, %v1131_v8 }
 0x145   :  { %v1135_v12 = vpop.eup %1134  ;;  %v436_v14 = vadd.f32 1.0, %v1133_v9 }
 0x146   :  { %v1137_v15 = vpop.eup %1136  ;;  %v443_v16 = vmul.f32 %v435_v11, %v411_v10  ;;  %v437_v18 = vadd.f32 1.0, %v1135_v12 }
 0x147   :  { %v1139_v19 = vpop.eup %1138  ;;  %v444_v20 = vmul.f32 %v436_v14, %v412_v13  ;;  %v438_v22 = vadd.f32 1.0, %v1137_v15  ;;  %v500_v13 = vpop.permute.xlu0 %499 }
 0x148   :  { %v1141_v23 = vpop.eup %1140  ;;  %v445_v24 = vmul.f32 %v437_v18, %v413_v17  ;;  %v439_v26 = vadd.f32 1.0, %v1139_v19 }
 0x149   :  { %v1143_v27 = vpop.eup %1142  ;;  %v1093_v28 = vpack.c.bf16 %v444_v20, %v443_v16  ;;  %v446_v29 = vmul.f32 %v438_v22, %v414_v21  ;;  %v440_v31 = vadd.f32 1.0, %v1141_v23  ;;  %v505_v16 = vpop.permute.xlu1 %504 }
 0x14a   :  { %v1145_v32 = vpop.eup %1144  ;;  %v447_v33 = vmul.f32 %v439_v26, %v415_v25  ;;  %v441_v35 = vadd.f32 1.0, %v1143_v27 }
 0x14b   :  { %1094 = vmatprep.subr.bf16.mxu1 %v1093_v28  ;;  %v1097_v36 = vpack.c.bf16 %v446_v29, %v445_v24  ;;  %v448_v37 = vmul.f32 %v440_v31, %v416_v30  ;;  %v442_v39 = vadd.f32 1.0, %v1145_v32 }
 0x14c   :  { %1096 = vmatpush3.bf16.msra.mxu1 %v1093_v28  ;;  %v449_v40 = vmul.f32 %v441_v35, %v417_v34 }
 0x14d   :  { %1098 = vmatprep.subr.bf16.mxu1 %v1097_v36  ;;  %v1101_v41 = vpack.c.bf16 %v448_v37, %v447_v33  ;;  %v450_v42 = vmul.f32 %v442_v39, %v418_v38 }
 0x14f   :  { %v1105_v43 = vpack.c.bf16 %v450_v42, %v449_v40 }
 0x150   :  { %1100 = vmatpush3.bf16.msra.mxu1 %v1097_v36 }
 0x151   :  { %1102 = vmatprep.subr.bf16.mxu1 %v1101_v41 }
 0x154   :  { %1104 = vmatpush3.bf16.msra.mxu1 %v1101_v41 }
 0x155   :  { %1106 = vmatprep.subr.bf16.mxu1 %v1105_v43 }
 0x158   :  { %1108 = vmatpush3.bf16.msra.mxu1 %v1105_v43 }
 0x15b   :  { %1055 = vmatmul.mubr.msk.f32.vlgmr.msra.gmra.mrb[0].mxu1 %vm507_vm1, %v452_v44 }
 0x15c   :  { %1057 = vmatprep.mubr.msk.f32.mxu1 %vm507_vm1, %v453_v45 }
 0x15f   :  { %1058 = vmatmul.mubr.msk.f32.gmra.mrb[2].mxu1 %vm507_vm1, %v454_v46 }
 0x160   :  { %1060 = vmatprep.mubr.msk.f32.mxu1 %vm507_vm1, %v455_v47 }
 0x163   :  { %1061 = vmatmul.mubr.msk.f32.gmra.mrb[4].mxu1 %vm507_vm1, %v456_v56 }
 0x164   :  { %1063 = vmatprep.mubr.msk.f32.mxu1 %vm507_vm1, %v457_v57 }
 0x167   :  { %1064 = vmatmul.mubr.msk.f32.gmra.mrb[6].mxu1 %vm507_vm1, %v458_v58 }
 0x22e   :  { %v1056_v63 = vpop.f32.mrb[0].mxu1 }
 0x22f   :  { %v604_v1 = vadd.f32 %v1056_v63, %v475_v61  ;;  %v598_v54 = vpop.f32.mrb[1].mxu1 }
 0x230   :  { %v599_v48 = vadd.f32 %v598_v54, %v470_v60 }
 0x231   :  { %v654_v49 = vsel %vm244_vm2, %v604_v1, 0.0 }
 0x232   :  { %v653_v50 = vsel %vm244_vm2, %v599_v48, 0.0  ;;  %v1059_v51 = vpop.f32.mrb[2].mxu1 }
 0x233   :  { %v655_v52 = vadd.f32 %v654_v49, %v653_v50  ;;  %v608_v53 = vpop.f32.mrb[3].mxu1  ;;  %v614_v2 = vadd.f32 %v1059_v51, %v485_v0  ;;  %v731_v0 = vpop.permute.xlu1 %730 }
 0x234   :  { %v609_v3 = vadd.f32 %v608_v53, %v480_v62  ;;  %v726_v62 = vpop.permute.xlu0 %725 }
 0x235   :  { %v658_v9 = vsel %vm244_vm2, %v614_v2, 0.0 }
 0x236   :  { %v656_v5 = vsel %vm244_vm2, %v609_v3, 0.0  ;;  %v1062_v6 = vpop.f32.mrb[4].mxu1 }
 0x237   :  { %v657_v7 = vadd.f32 %v656_v5, %v655_v52  ;;  %v618_v8 = vpop.f32.mrb[5].mxu1  ;;  %v624_v10 = vadd.f32 %v1062_v6, %v495_v4 }
 0x238   :  { %v619_v11 = vadd.f32 %v618_v8, %v490_v55  ;;  %v774_v53 = vpop.permute.xlu0 %773 }
 0x239   :  { %v659_v12 = vadd.f32 %v658_v9, %v657_v7  ;;  %v662_v19 = vsel %vm244_vm2, %v624_v10, 0.0 }
 0x23a   :  { %v660_v14 = vsel %vm244_vm2, %v619_v11, 0.0  ;;  %v1065_v15 = vpop.f32.mrb[6].mxu1 }
 0x23b   :  { %v661_v17 = vadd.f32 %v660_v14, %v659_v12  ;;  %v628_v18 = vpop.f32.mrb[7].mxu1  ;;  %v634_v20 = vadd.f32 %v1065_v15, %v505_v16 }
 0x23c   :  { %v629_v21 = vadd.f32 %v628_v18, %v500_v13  ;;  %v736_v6 = vpop.permute.xlu0 %735 }
 0x23d   :  { %v663_v22 = vadd.f32 %v662_v19, %v661_v17  ;;  %v666_v25 = vsel %vm244_vm2, %v634_v20, 0.0 }
 0x23e   :  { %v664_v23 = vsel %vm244_vm2, %v629_v21, 0.0 }
 0x23f   :  { %v665_v24 = vadd.f32 %v664_v23, %v663_v22 }
 0x241   :  { %v667_v26 = vadd.f32 %v666_v25, %v665_v24 }
 0x243   :  { %v668_v27 = vrot.slane %v667_v26, 4 }
 0x245   :  { %v669_v28 = vadd.f32 %v668_v27, %v667_v26 }
 0x247   :  { %v670_v29 = vrot.slane %v669_v28, 2 }
 0x249   :  { %v671_v30 = vadd.f32 %v670_v29, %v669_v28 }
 0x24b   :  { %v672_v31 = vrot.slane %v671_v30, 1 }
 0x24d   :  { %v673_v32 = vadd.f32 %v672_v31, %v671_v30 }
 0x24f   :  { %v674_v33 = vmul.f32 0.015625, %v673_v32 }
 0x251   :  { %v675_v34 = vsub.f32 %v599_v48, %v674_v33  ;;  %v676_v35 = vsub.f32 %v604_v1, %v674_v33  ;;  %v677_v36 = vsub.f32 %v609_v3, %v674_v33  ;;  %v678_v37 = vsub.f32 %v614_v2, %v674_v33  ;;  %v779_v2 = vpop.permute.xlu1 %778 }
 0x252   :  { %v679_v38 = vsub.f32 %v619_v11, %v674_v33  ;;  %v680_v39 = vsub.f32 %v624_v10, %v674_v33  ;;  %v681_v40 = vsub.f32 %v629_v21, %v674_v33  ;;  %v682_v41 = vsub.f32 %v634_v20, %v674_v33  ;;  %v784_v11 = vpop.permute.xlu0 %783 }
 0x253   :  { %v683_v42 = vmul.f32 %v675_v34, %v675_v34  ;;  %v684_v43 = vmul.f32 %v676_v35, %v676_v35  ;;  %v685_v44 = vmul.f32 %v677_v36, %v677_v36  ;;  %v686_v45 = vmul.f32 %v678_v37, %v678_v37 }
 0x254   :  { %v687_v57 = vmul.f32 %v679_v38, %v679_v38  ;;  %v688_v60 = vmul.f32 %v680_v39, %v680_v39  ;;  %v689_v1 = vmul.f32 %v681_v40, %v681_v40  ;;  %v690_v49 = vmul.f32 %v682_v41, %v682_v41 }
 0x255   :  { %v691_v46 = vsel %vm244_vm2, %v683_v42, 0.0  ;;  %v692_v47 = vsel %vm244_vm2, %v684_v43, 0.0  ;;  %v694_v58 = vsel %vm244_vm2, %v685_v44, 0.0  ;;  %v696_v61 = vsel %vm244_vm2, %v686_v45, 0.0  ;;  %v741_v8 = vpop.permute.xlu1 %740 }
 0x256   :  { %v693_v56 = vadd.f32 %v692_v47, %v691_v46  ;;  %v698_v54 = vsel %vm244_vm2, %v687_v57, 0.0  ;;  %v700_v50 = vsel %vm244_vm2, %v688_v60, 0.0  ;;  %v702_v52 = vsel %vm244_vm2, %v689_v1, 0.0  ;;  %v746_v16 = vpop.permute.xlu0 %745 }
 0x257   :  { %v704_v3 = vsel %vm244_vm2, %v690_v49, 0.0 }
 0x258   :  { %v695_v59 = vadd.f32 %v694_v58, %v693_v56 }
 0x259   :  { %v789_v13 = vpop.permute.xlu1 %788 }
 0x25a   :  { %v697_v63 = vadd.f32 %v696_v61, %v695_v59  ;;  %v794_v19 = vpop.permute.xlu0 %793 }
 0x25c   :  { %v699_v48 = vadd.f32 %v698_v54, %v697_v63 }
 0x25d   :  { %v751_v18 = vpop.permute.xlu1 %750 }
 0x25e   :  { %v701_v51 = vadd.f32 %v700_v50, %v699_v48  ;;  %v756_v22 = vpop.permute.xlu0 %755 }
 0x260   :  { %v703_v55 = vadd.f32 %v702_v52, %v701_v51 }
 0x261   :  { %v799_v20 = vpop.permute.xlu1 %798 }
 0x262   :  { %v705_v4 = vadd.f32 %v704_v3, %v703_v55  ;;  %v804_v59 = vpop.permute.xlu0 %803 }
 0x264   :  { %v706_v5 = vrot.slane %v705_v4, 4 }
 0x265   :  { %v761_v23 = vpop.permute.xlu1 %760 }
 0x266   :  { %v707_v7 = vadd.f32 %v706_v5, %v705_v4 }
 0x268   :  { %v708_v9 = vrot.slane %v707_v7, 2 }
 0x26a   :  { %v709_v10 = vadd.f32 %v708_v9, %v707_v7 }
 0x26c   :  { %v710_v12 = vrot.slane %v709_v10, 1 }
 0x26e   :  { %v711_v14 = vadd.f32 %v710_v12, %v709_v10 }
 0x270   :  { %v712_v15 = vmul.f32 0.015625, %v711_v14 }
 0x272   :  { %v713_v17 = vadd.f32 1e-05, %v712_v15 }
 0x274   :  { %1146 = vrsqrt.f32 %v713_v17 }
 0x27e   :  { %v1147_v21 = vpop.eup %1146 }
 0x27f   :  { %v721_v24 = vmul.f32 %v1147_v21, %v681_v40  ;;  %v715_v25 = vmul.f32 %v1147_v21, %v675_v34  ;;  %v716_v26 = vmul.f32 %v1147_v21, %v676_v35  ;;  %v717_v27 = vmul.f32 %v1147_v21, %v677_v36  ;;  %v809_v36 = vpop.permute.xlu1 %808 }
 0x280   :  { %v718_v28 = vmul.f32 %v1147_v21, %v678_v37  ;;  %v719_v29 = vmul.f32 %v1147_v21, %v679_v38  ;;  %v720_v30 = vmul.f32 %v1147_v21, %v680_v39  ;;  %v722_v31 = vmul.f32 %v1147_v21, %v682_v41 }
 0x281   :  { %v769_v32 = vmul.f32 %v756_v22, %v721_v24  ;;  %v763_v33 = vmul.f32 %v726_v62, %v715_v25  ;;  %v764_v42 = vmul.f32 %v731_v0, %v716_v26  ;;  %v765_v43 = vmul.f32 %v736_v6, %v717_v27 }
 0x282   :  { %v766_v44 = vmul.f32 %v741_v8, %v718_v28  ;;  %v767_v45 = vmul.f32 %v746_v16, %v719_v29  ;;  %v768_v46 = vmul.f32 %v751_v18, %v720_v30  ;;  %v770_v47 = vmul.f32 %v761_v23, %v722_v31  ;;  %v860_v30 = vld [vmem:[%s1511_s9 + $0x8] sm:$0xff]  ;;  %v871_v31 = vpop.permute.xlu0 %870 }
 0x283   :  { %v811_v56 = vadd.f32 %v774_v53, %v763_v33  ;;  %v812_v57 = vadd.f32 %v779_v2, %v764_v42  ;;  %v813_v58 = vadd.f32 %v784_v11, %v765_v43  ;;  %v817_v37 = vadd.f32 %v804_v59, %v769_v32  ;;  %v866_v33 = vpop.permute.xlu1 %865 }
 0x284   :  { %v814_v40 = vadd.f32 %v789_v13, %v766_v44  ;;  %v815_v34 = vadd.f32 %v794_v19, %v767_v45  ;;  %v816_v35 = vadd.f32 %v799_v20, %v768_v46  ;;  %v818_v60 = vadd.f32 %v809_v36, %v770_v47 }
 0x285   :  { %v827_v38 = vmul.f32 0.70710677, %v811_v56  ;;  %v828_v39 = vmul.f32 0.70710677, %v812_v57  ;;  %v829_v41 = vmul.f32 0.70710677, %v813_v58 }
 0x286   :  { %v830_v61 = vmul.f32 0.70710677, %v814_v40  ;;  %v831_v62 = vmul.f32 0.70710677, %v815_v34  ;;  %v832_v63 = vmul.f32 0.70710677, %v816_v35 }
 0x287   :  { %1148 = verf.f32 %v827_v38  ;;  %v833_v0 = vmul.f32 0.70710677, %v817_v37  ;;  %v834_v1 = vmul.f32 0.70710677, %v818_v60  ;;  %v819_v49 = vmul.f32 0.5, %v811_v56 }
 0x288   :  { %1150 = verf.f32 %v828_v39  ;;  %v820_v52 = vmul.f32 0.5, %v812_v57  ;;  %v821_v3 = vmul.f32 0.5, %v813_v58  ;;  %v822_v7 = vmul.f32 0.5, %v814_v40 }
 0x289   :  { %1152 = verf.f32 %v829_v41  ;;  %v823_v11 = vmul.f32 0.5, %v815_v34  ;;  %v824_v16 = vmul.f32 0.5, %v816_v35  ;;  %v825_v20 = vmul.f32 0.5, %v817_v37 }
 0x28a   :  { %1154 = verf.f32 %v830_v61  ;;  %v826_v24 = vmul.f32 0.5, %v818_v60 }
 0x28b   :  { %1156 = verf.f32 %v831_v62 }
 0x28c   :  { %1158 = verf.f32 %v832_v63 }
 0x28d   :  { %1160 = verf.f32 %v833_v0 }
 0x28e   :  { %1162 = verf.f32 %v834_v1 }
 0x291   :  { %v1149_v54 = vpop.eup %1148 }
 0x292   :  { %v1151_v48 = vpop.eup %1150  ;;  %v843_v50 = vadd.f32 1.0, %v1149_v54 }
 0x293   :  { %v1153_v51 = vpop.eup %1152  ;;  %v844_v53 = vadd.f32 1.0, %v1151_v48 }
 0x294   :  { %v1155_v55 = vpop.eup %1154  ;;  %v851_v2 = vmul.f32 %v843_v50, %v819_v49  ;;  %v845_v4 = vadd.f32 1.0, %v1153_v51 }
 0x295   :  { %v1157_v5 = vpop.eup %1156  ;;  %v852_v6 = vmul.f32 %v844_v53, %v820_v52  ;;  %v846_v8 = vadd.f32 1.0, %v1155_v55 }
 0x296   :  { %v1159_v9 = vpop.eup %1158  ;;  %v853_v10 = vmul.f32 %v845_v4, %v821_v3  ;;  %v847_v12 = vadd.f32 1.0, %v1157_v5 }
 0x297   :  { %v1161_v13 = vpop.eup %1160  ;;  %v1109_v14 = vpack.c.bf16 %v852_v6, %v851_v2  ;;  %v854_v15 = vmul.f32 %v846_v8, %v822_v7  ;;  %v848_v17 = vadd.f32 1.0, %v1159_v9 }
 0x298   :  { %v1163_v18 = vpop.eup %1162  ;;  %v855_v19 = vmul.f32 %v847_v12, %v823_v11  ;;  %v849_v21 = vadd.f32 1.0, %v1161_v13 }
 0x299   :  { %1110 = vmatprep.subr.bf16.mxu0 %v1109_v14  ;;  %v1113_v22 = vpack.c.bf16 %v854_v15, %v853_v10  ;;  %v856_v23 = vmul.f32 %v848_v17, %v824_v16  ;;  %v850_v25 = vadd.f32 1.0, %v1163_v18 }
 0x29a   :  { %1112 = vmatpush3.bf16.msra.mxu0 %v1109_v14  ;;  %v857_v26 = vmul.f32 %v849_v21, %v825_v20 }
 0x29b   :  { %1114 = vmatprep.subr.bf16.mxu0 %v1113_v22  ;;  %v1117_v27 = vpack.c.bf16 %v856_v23, %v855_v19  ;;  %v858_v28 = vmul.f32 %v850_v25, %v826_v24 }
 0x29d   :  { %v1121_v29 = vpack.c.bf16 %v858_v28, %v857_v26 }
 0x29e   :  { %1116 = vmatpush3.bf16.msra.mxu0 %v1113_v22 }
 0x29f   :  { %1118 = vmatprep.subr.bf16.mxu0 %v1117_v27 }
 0x2a2   :  { %1120 = vmatpush3.bf16.msra.mxu0 %v1117_v27 }
 0x2a3   :  { %1122 = vmatprep.subr.bf16.mxu0 %v1121_v29 }
 0x2a6   :  { %1124 = vmatpush3.bf16.msra.mxu0 %v1121_v29 }
 0x2a9   :  { %1083 = vmatmul.mubr.msk.f32.vlgmr.msra.gmra.mrb[8].mxu0 %vm507_vm1, %v860_v30 }
 0x37c   :  { %v1084_v32 = vpop.f32.mrb[8].mxu0 }
 0x37d   :  { %v951_v42 = vadd.f32 %v1084_v32, %v871_v31  ;;  %v945_v43 = vpop.f32.mrb[9].mxu0 }
 0x37e   :  { %v946_v44 = vadd.f32 %v945_v43, %v866_v33 }
 0x37f   :  { %v955_v45 = vmul.f32 1.442695, %v951_v42 }
 0x380   :  { %954 = vst.msk [vmem:[%s1512_s11] sm:$0xff] %vm244_vm2, %v946_v44 }
 0x381   :  { %1164 = vpow2.f32 %v955_v45 }
 0x38b   :  { %v1165_v46 = vpop.eup %1164 }
 0x38c   :  { %957 = vst.msk [vmem:[%s1512_s11 + $0x8] sm:$0xff] %vm244_vm2, %v1165_v46 }

</bundles_post_ra>
